<compile_context>
chip_gen: v6e
topology: v6e:2x2x1
jax: 0.10.0
libtpu: 0.0.40
codegen_flags: <defaults>
</compile_context>

<pallas_src>
import functools

import numpy as np
import jax
import jax.numpy as jnp
from jax.experimental import pallas as pl
from jax.experimental.pallas import tpu as pltpu


LANE = 128
MAX_ROW_TILE = 2048
MIN_ROW_TILE_TARGET = 512            # rows/step at which HBM roofline is ~85%
SEL_SINGLE_BLOCK_MAX_BYTES = 6 * 1024 * 1024
_SUBLANE = {2: 16, 4: 8}             # itemsize -> sublane multiple


def _round_up(a: int, b: int) -> int:
    return -(-a // b) * b


def _round_down(a: int, b: int) -> int:
    return a // b * b


# --------------------------------------------------------------------------
# Kernel bodies.  Grid is always (row_steps, k_steps, f_steps); axis 2 is the
# F (contraction) reduction axis and is marked "arbitrary".
# --------------------------------------------------------------------------
def _fm_kernel_direct(x_ref, sel_ref, o_ref):
    """Single F step: write the output block directly, no accumulator."""
    o_ref[...] = jnp.dot(
        x_ref[...], sel_ref[...], preferred_element_type=jnp.float32
    ).astype(o_ref.dtype)


def _fm_kernel_acc_out(x_ref, sel_ref, o_ref):
    """F tiled, f32 output: accumulate into the resident o_ref block."""

    @pl.when(pl.program_id(2) == 0)
    def _init():
        o_ref[...] = jnp.zeros_like(o_ref)

    o_ref[...] += jnp.dot(
        x_ref[...], sel_ref[...], preferred_element_type=jnp.float32
    )


def _fm_kernel_acc_scratch(x_ref, sel_ref, o_ref, acc_ref):
    """F tiled, non-f32 output: f32 scratch accumulator, cast on finalize."""

    @pl.when(pl.program_id(2) == 0)
    def _init():
        acc_ref[...] = jnp.zeros_like(acc_ref)

    acc_ref[...] += jnp.dot(
        x_ref[...], sel_ref[...], preferred_element_type=jnp.float32
    )

    @pl.when(pl.program_id(2) == pl.num_programs(2) - 1)
    def _finalize():
        o_ref[...] = acc_ref[...].astype(o_ref.dtype)


# --------------------------------------------------------------------------
# VMEM / tiling policy.
# --------------------------------------------------------------------------
@functools.lru_cache(maxsize=1)
def _vmem_policy():
    """(tile_budget_bytes, vmem_limit_bytes) for the current TPU generation."""
    phys = None
    try:
        info = pltpu.get_tpu_info()
        phys = int(getattr(info, "vmem_capacity_bytes", 0)) or None
    except Exception:
        phys = None
    if phys is None:
        try:
            kind = jax.devices()[0].device_kind.lower()
            phys = (64 if ("v7" in kind or "7x" in kind) else 128) * 1024 * 1024
        except Exception:
            phys = 64 * 1024 * 1024          # conservative (v7x-sized)
    budget = (phys * 5) // 8                 # ~80 MiB v5e/v6e, ~40 MiB v7x
    limit = min(phys - 8 * 1024 * 1024, budget + 16 * 1024 * 1024)
    return int(budget), int(limit)


def _f_block_candidates(F, max_bf):
    cands = []
    if max_bf is None or F <= max_bf:
        cands.append(F)                      # untiled F (preferred)
    for d in (2048, 1024, 512, 256):
        if d < F and F % d == 0 and (max_bf is None or d <= max_bf):
            cands.append(d)                  # exact 128-multiple divisors only
    return cands or [F]


def _choose_tiles(M, F, K, itemsize, vmem_budget, *, max_bn=None, max_bf=None):
    """Return (tm, bn, bf, Kp) or None (meaning: use the XLA gather path)."""
    sub = _SUBLANE.get(itemsize, 8)

    # ---- K axis: keep the selection matrix as a single lane-dense block
    # whenever it is small; otherwise tile with MXU-filling 256/512 columns.
    Kp128 = _round_up(K, LANE)
    sel_single = F * Kp128 * itemsize <= SEL_SINGLE_BLOCK_MAX_BYTES
    if max_bn is not None and Kp128 > max_bn:
        sel_single = False
    if sel_single:
        Kp, bn = Kp128, Kp128
    else:
        Kp = _round_up(K, 256)
        bn = 512 if Kp % 512 == 0 else 256
        if max_bn is not None:
            bn = min(bn, max(256, _round_down(max_bn, 256)))
            if Kp % bn != 0:
                bn = 256

    # ---- F axis + row tile sized from the VMEM budget:
    #   2x (tm, bf) x  +  sel_bufs x (bf, bn) sel  +  2x (tm, bn) out
    #   [+ (tm, bn) f32 scratch when F is tiled and output is not f32]
    best = None
    for bf in _f_block_candidates(F, max_bf):
        f_tiled = bf != F
        k_tiled = bn != Kp
        sel_bufs = 1 if (not f_tiled and not k_tiled) else 2
        fixed = sel_bufs * bf * bn * itemsize
        per_row = 2 * bf * itemsize + 2 * bn * itemsize
        if f_tiled and itemsize != 4:
            per_row += bn * 4
        tm = (vmem_budget - fixed) // max(per_row, 1)
        tm = _round_down(int(min(MAX_ROW_TILE, tm)), sub)
        cand = (tm, bn, bf)
        if tm >= min(MIN_ROW_TILE_TARGET, _round_up(M, sub)):
            best = cand
            break                             # largest bf with a good row tile
        if best is None or tm > best[0]:
            best = cand
    tm, bn, bf = best
    if tm < 8:
        return None                           # cannot tile under budget

    # ---- Balance the row grid (keeps both v7x TensorCores busy, avoids a
    # single exposed prologue/epilogue DMA and skewed splits like 2048/452).
    if M <= 256 and tm >= M:
        tm = M                                # single step, full-rows block
    else:
        n_steps = max(2, -(-M // max(tm, sub)))
        if n_steps < 4 and M >= 4 * MIN_ROW_TILE_TARGET:
            n_steps = 4                       # >= 2 row steps per v7x core
        tm = min(max(tm, sub), _round_up(-(-M // n_steps), sub))
    return tm, bn, bf, Kp


# --------------------------------------------------------------------------
# Selection-matrix cache and mask analysis.
# --------------------------------------------------------------------------
_SEL_CACHE = {}


def _selection_matrix(mask_bytes, idx, F, Kp, dtype):
    key = (mask_bytes, F, Kp, jnp.dtype(dtype).name)
    sel = _SEL_CACHE.get(key)
    if sel is None:
        sel_np = np.zeros((F, Kp), dtype=np.float32)
        sel_np[idx, np.arange(idx.shape[0])] = 1.0
        sel = jnp.asarray(sel_np, dtype=dtype)
        _SEL_CACHE[key] = sel
    return sel


def _mask_runs(mask):
    idx = np.nonzero(mask)[0]
    if idx.size == 0:
        return []
    brk = np.nonzero(np.diff(idx) != 1)[0]
    starts = np.concatenate(([idx[0]], idx[brk + 1]))
    stops = np.concatenate((idx[brk] + 1, [idx[-1] + 1]))
    return list(zip(starts.tolist(), stops.tolist()))


# --------------------------------------------------------------------------
# Public forward: equivalent of PyTorch `x[..., feature_mask]`.
# --------------------------------------------------------------------------
def feature_mask_forward(x, feature_mask_np, *, force_pallas=False,
                         max_bn=None, max_bf=None):
    mask = np.asarray(feature_mask_np, dtype=bool)
    F = x.shape[-1]
    assert mask.shape == (F,)

    idx = np.nonzero(mask)[0]
    K = int(idx.shape[0])
    lead = x.shape[:-1]
    M = int(np.prod(lead)) if lead else 1

    if K == 0:                                # all-False mask
        return jnp.zeros(lead + (0,), dtype=x.dtype)

    dt = jnp.dtype(x.dtype)
    pallas_ok = dt in (jnp.dtype(jnp.float32), jnp.dtype(jnp.bfloat16))

    if not force_pallas:
        runs = _mask_runs(mask)
        if len(runs) == 1 and runs[0] == (0, F):
            return x                          # identity mask
        if len(runs) <= 4:
            # Few contiguous runs (incl. dense masks with few holes): a
            # memory-bound slice+concat beats the one-hot matmul outright.
            parts = [jax.lax.slice_in_dim(x, s, e, axis=-1) for s, e in runs]
            return parts[0] if len(parts) == 1 else jnp.concatenate(parts, axis=-1)
        if (not pallas_ok) or F <= 256 or M < 8 or F > 8192:
            # int / f64 dtypes, tiny shapes, or huge F (matmul too flop-heavy):
            # plain XLA static gather.
            return jnp.take(x, jnp.asarray(idx, dtype=jnp.int32), axis=-1)
    elif not pallas_ok:
        return jnp.take(x, jnp.asarray(idx, dtype=jnp.int32), axis=-1)

    itemsize = dt.itemsize
    vmem_budget, vmem_limit = _vmem_policy()
    tiles = _choose_tiles(M, F, K, itemsize, vmem_budget,
                          max_bn=max_bn, max_bf=max_bf)
    if tiles is None:
        return jnp.take(x, jnp.asarray(idx, dtype=jnp.int32), axis=-1)
    tm, bn, bf, Kp = tiles

    # Static 0/1 selection matrix (same dtype as x -> homogeneous, exact dot),
    # zero-padded to a lane-dense (., Kp) output; cached per mask.
    sel = _selection_matrix(mask.tobytes(), idx, F, Kp, dt)
    x2 = x.reshape(M, F)

    grid = (pl.cdiv(M, tm), Kp // bn, F // bf)
    k_steps, f_steps = grid[1], grid[2]

    sel_invariant = (k_steps == 1 and f_steps == 1)
    if sel_invariant:
        sel_spec = pl.BlockSpec((bf, bn), lambda i, j, f: (f, j),
                                pipeline_mode=pl.Buffered(1))
    else:
        sel_spec = pl.BlockSpec((bf, bn), lambda i, j, f: (f, j))

    if f_steps == 1:
        kernel = _fm_kernel_direct            # no accumulator at all
        scratch = []
    elif dt == jnp.dtype(jnp.float32):
        kernel = _fm_kernel_acc_out           # accumulate into resident o_ref
        scratch = []
    else:
        kernel = _fm_kernel_acc_scratch       # f32 scratch, cast on finalize
        scratch = [pltpu.VMEM((tm, bn), jnp.float32)]

    cost = pl.CostEstimate(
        flops=2 * M * F * Kp,
        transcendentals=0,
        bytes_accessed=(M * F * itemsize * k_steps            # x re-read per K tile
                        + F * Kp * itemsize * (1 if sel_invariant else grid[0])
                        + M * Kp * itemsize),
    )

    out_2d = pl.pallas_call(
        kernel,
        out_shape=jax.ShapeDtypeStruct((M, Kp), x.dtype),
        grid_spec=pltpu.PrefetchScalarGridSpec(
            num_scalar_prefetch=0,
            grid=grid,
            in_specs=[
                pl.BlockSpec((tm, bf), lambda i, j, f: (i, f)),
                sel_spec,
            ],
            out_specs=pl.BlockSpec((tm, bn), lambda i, j, f: (i, j)),
            scratch_shapes=scratch,
        ),
        compiler_params=pltpu.CompilerParams(
            dimension_semantics=("parallel", "parallel", "arbitrary"),
            vmem_limit_bytes=vmem_limit,
        ),
        cost_estimate=cost,
    )(x2, sel)

    if Kp != K:
        out_2d = out_2d[:, :K]                # drop lane padding (original K!)
    return out_2d.reshape(*lead, K)


if __name__ == "__main__":
    key = jax.random.PRNGKey(0)
    k1, k2, k3, k4, k5 = jax.random.split(key, 5)

    # --- Case 1: module-implied small shape; dispatcher + forced Pallas ------
    F1 = 16
    mask1 = (np.arange(F1) % 2 == 0)                               # K = 8
    x1 = jax.random.normal(k1, (2, 4, 16, F1), dtype=jnp.float32)
    ref1 = x1[..., jnp.asarray(mask1)]
    out1_fast = jax.block_until_ready(feature_mask_forward(x1, mask1))
    np.testing.assert_allclose(np.asarray(out1_fast), np.asarray(ref1), rtol=0, atol=0)
    out1 = jax.block_until_ready(feature_mask_forward(x1, mask1, force_pallas=True))
    assert out1.shape == ref1.shape, (out1.shape, ref1.shape)
    np.testing.assert_allclose(np.asarray(out1), np.asarray(ref1), rtol=0, atol=0)

    # --- Case 2: contiguous-run mask -> slice+concat fast path ---------------
    F2 = 32
    mask2 = np.zeros(F2, dtype=bool)
    mask2[3:11] = True
    mask2[20:29] = True
    x2 = jax.random.normal(k2, (2, 4, 8, F2), dtype=jnp.float32)
    out2 = jax.block_until_ready(feature_mask_forward(x2, mask2))
    np.testing.assert_allclose(np.asarray(out2),
                               np.asarray(x2[..., jnp.asarray(mask2)]), rtol=0, atol=0)

    # --- Case 3: multi row-step grid, single sel block, direct kernel --------
    F3 = 384
    mask3 = (np.arange(F3) % 3 != 0)                               # K = 256
    x3 = jax.random.normal(k3, (2, 4, 64, F3), dtype=jnp.float32)  # 512 rows
    out3 = jax.block_until_ready(feature_mask_forward(x3, mask3, force_pallas=True))
    np.testing.assert_allclose(np.asarray(out3),
                               np.asarray(x3[..., jnp.asarray(mask3)]), rtol=0, atol=0)

    # --- Case 4: F-reduction grid axis, accumulate directly into o_ref (f32) -
    F4 = 1024
    mask4 = (np.arange(F4) % 4 == 0)                               # K = 256
    x4 = jax.random.normal(k4, (2, 8, F4), dtype=jnp.float32)      # 16 rows
    out4 = jax.block_until_ready(
        feature_mask_forward(x4, mask4, force_pallas=True, max_bf=256))
    np.testing.assert_allclose(np.asarray(out4),
                               np.asarray(x4[..., jnp.asarray(mask4)]), rtol=0, atol=0)

    # --- Case 5: K-tiled + F-tiled grid with bf16 scratch accumulator --------
    F5 = 1024
    mask5 = (np.arange(F5) % 8) < 5                                # K = 640
    x5 = jax.random.normal(k5, (2, 128, F5), dtype=jnp.bfloat16)   # 256 rows
    out5 = jax.block_until_ready(
        feature_mask_forward(x5, mask5, force_pallas=True, max_bn=256, max_bf=512))
    ref5 = x5[..., jnp.asarray(mask5)]
    np.testing.assert_allclose(np.asarray(out5).astype(np.float32),
                               np.asarray(ref5).astype(np.float32), rtol=0, atol=0)

    # --- Case 6: all-False mask ----------------------------------------------
    out6 = feature_mask_forward(x1, np.zeros(F1, dtype=bool))
    assert out6.shape == (2, 4, 16, 0)

    print("KERNEL_OK")
</pallas_src>

<mosaic_0001>
module attributes {stable_mosaic.version = 11 : i64} {
  func.func @_fm_kernel_direct(%arg0: i32, %arg1: i32, %arg2: i32, %arg3: memref<128x16xf32, #tpu.memory_space<vmem>>, %arg4: memref<16x128xf32, #tpu.memory_space<vmem>>, %arg5: memref<128x128xf32, #tpu.memory_space<vmem>>) attributes {dimension_semantics = [#tpu.dimension_semantics<parallel>, #tpu.dimension_semantics<parallel>, #tpu.dimension_semantics<arbitrary>], iteration_bounds = array<i64: 1, 1, 1>, scalar_prefetch = 0 : i64, scratch_operands = 0 : i64, tpu.core_type = #tpu.core_type<tc>, window_params = [{transform_indices = @transform_0, window_bounds = array<i64: 128, 16>}, {pipeline_mode = #tpu.pipeline_mode<synchronous>, transform_indices = @transform_1, window_bounds = array<i64: 16, 128>}, {transform_indices = @transform_2, window_bounds = array<i64: 128, 128>}]} {
    %c0 = arith.constant 0 : index
    %c0_0 = arith.constant 0 : index
    %0 = vector.load %arg3[%c0, %c0_0] : memref<128x16xf32, #tpu.memory_space<vmem>>, vector<128x16xf32>
    %c0_1 = arith.constant 0 : index
    %c0_2 = arith.constant 0 : index
    %1 = vector.load %arg4[%c0_1, %c0_2] : memref<16x128xf32, #tpu.memory_space<vmem>>, vector<16x128xf32>
    %cst = arith.constant dense<0.000000e+00> : vector<128x128xf32>
    %2 = tpu.matmul %0, %1, %cst {dimension_numbers = #tpu.dot_dimension_numbers<[1], [0], [0], [1], [0, 0, 1, 1], [], []>} : vector<128x16xf32>, vector<16x128xf32>, vector<128x128xf32> -> vector<128x128xf32>
    %c0_3 = arith.constant 0 : index
    %c0_4 = arith.constant 0 : index
    %3 = vector.load %arg5[%c0_3, %c0_4] : memref<128x128xf32, #tpu.memory_space<vmem>>, vector<128x128xf32>
    tpu.vector_store %arg5[%c0_3, %c0_4], %2 {strides = array<i32>} : memref<128x128xf32, #tpu.memory_space<vmem>>, vector<128x128xf32>,
    return
  }
  func.func @transform_0(%arg0: i32, %arg1: i32, %arg2: i32) -> (i32, i32) {
    %c0_i32 = arith.constant 0 : i32
    return %arg0, %arg2 : i32, i32
  }
  func.func @transform_1(%arg0: i32, %arg1: i32, %arg2: i32) -> (i32, i32) {
    %c0_i32 = arith.constant 0 : i32
    return %arg2, %arg1 : i32, i32
  }
  func.func @transform_2(%arg0: i32, %arg1: i32, %arg2: i32) -> (i32, i32) {
    %c0_i32 = arith.constant 0 : i32
    return %arg0, %arg1 : i32, i32
  }
}

</mosaic_0001>

<bundles_post_ra>
// kernel: tpu_custom_call.1
= control target key start
LH: loop header
LB: loop body
LE: loop exit
PB: predicated region body
PF: predicated region fallthrough
CT: control target
= control target key end

     0   :  { %vm30_vm0 = vcmask 130048   ;;  %s438_s0 = inlined_call_operand.vmem [shape: f32[128,16], index: 0, kind: input, shape index: {}]   ;;  %s439_s1 = inlined_call_operand.vmem [shape: f32[16,128], index: 1, kind: input, shape index: {}]   ;;  %s440_s2 = inlined_call_operand.hbm [shape: f32[128,128], index: 2, kind: output, shape index: {}]  }
   0x1   :  { %v29_v0 = vld [vmem:[%s439_s1 + $0x8] sm:$0xff]  ;;  %v28_v1 = vld [vmem:[%s439_s1] sm:$0xff]  ;;  %v14_v6 = vld [vmem:[%s438_s0 + $0x10] sm:$0xff] }
   0x2   :  { %290 = vmatprep.subr.mxu0 %v29_v0  ;;  %318 = vmatprep.subr.mxu1 %v29_v0  ;;  %v12_v2 = vld [vmem:[%s438_s0] sm:$0xff]  ;;  %v13_v4 = vld [vmem:[%s438_s0 + $0x8] sm:$0xff]  ;;  %v22_v7 = vld [vmem:[%s438_s0 + $0x50] sm:$0xff] }
   0x3   :  { %291 = vmatpush3.msra.mxu0 %v29_v0  ;;  %320 = vmatpush3.msra.mxu1 %v29_v0  ;;  %v20_v3 = vld [vmem:[%s438_s0 + $0x40] sm:$0xff]  ;;  %v21_v5 = vld [vmem:[%s438_s0 + $0x48] sm:$0xff] }
   0x4   :  { %292 = vmatprep.subr.mxu0 %v28_v1  ;;  %319 = vmatprep.subr.mxu1 %v28_v1 }
   0x5   :  { %293 = vmatpush3.msra.mxu0 %v28_v1  ;;  %321 = vmatpush3.msra.mxu1 %v28_v1 }
   0x6   :  { %294 = vmatprep.mubr.msk.f32.mxu0 %vm30_vm0, %v12_v2  ;;  %306 = vmatprep.mubr.msk.f32.mxu1 %vm30_vm0, %v20_v3 }
   0x7   :  { %295 = vmatmul.mubr.msk.f32.vlgmr.msra.gmra.mxu0 %vm30_vm0, %v13_v4  ;;  %307 = vmatmul.mubr.msk.f32.vlgmr.msra.gmra.mxu1 %vm30_vm0, %v21_v5 }
   0x8   :  { %7 = vsyncpa [#allocation3], 0  ;;  %297 = vmatprep.mubr.msk.f32.mxu0 %vm30_vm0, %v14_v6  ;;  %309 = vmatprep.mubr.msk.f32.mxu1 %vm30_vm0, %v22_v7  ;;  %v15_v8 = vld [vmem:[%s438_s0 + $0x18] sm:$0xff]  ;;  %v16_v10 = vld [vmem:[%s438_s0 + $0x20] sm:$0xff] }
   0x9   :  { %v23_v9 = vld [vmem:[%s438_s0 + $0x58] sm:$0xff]  ;;  %v24_v11 = vld [vmem:[%s438_s0 + $0x60] sm:$0xff]  ;;  %v17_v12 = vld [vmem:[%s438_s0 + $0x28] sm:$0xff] }
   0xa   :  { %v25_v13 = vld [vmem:[%s438_s0 + $0x68] sm:$0xff]  ;;  %v18_v14 = vld [vmem:[%s438_s0 + $0x30] sm:$0xff]  ;;  %v19_v16 = vld [vmem:[%s438_s0 + $0x38] sm:$0xff] }
   0xb   :  { %298 = vmatmul.mubr.msk.f32.gmra.mxu0 %vm30_vm0, %v15_v8  ;;  %310 = vmatmul.mubr.msk.f32.gmra.mxu1 %vm30_vm0, %v23_v9  ;;  %v26_v15 = vld [vmem:[%s438_s0 + $0x70] sm:$0xff]  ;;  %v27_v17 = vld [vmem:[%s438_s0 + $0x78] sm:$0xff]  ;;  %s347_s0 = smov [#allocation2]  }
   0xc   :  { %300 = vmatprep.mubr.msk.f32.mxu0 %vm30_vm0, %v16_v10  ;;  %312 = vmatprep.mubr.msk.f32.mxu1 %vm30_vm0, %v24_v11  ;;  %s245_s16 = sshll.u32 %s347_s0, 4  ;;  %s246_s16 = int_to_ptr.vmem [resolvable:$true] %s245_s16 }
   0xd   :  { %s325_s17 = scalar_lea.vmem %s246_s16, 2048  ;;  %p330_p1 = scmp.lt.s32.totalorder %s246_s16, %s246_s16 }
   0xe   :  { %p326_p0 = scmp.ne.s32.totalorder %s246_s16, %s325_s17  ;;  %p331_p2 = scmp.lt.s32.totalorder %s325_s17, %s325_s17 }
   0xf   :  { %301 = vmatmul.mubr.msk.f32.gmra.mxu0 %vm30_vm0, %v17_v12  ;;  %313 = vmatmul.mubr.msk.f32.gmra.mxu1 %vm30_vm0, %v25_v13 }
  0x10   :  { %303 = vmatprep.mubr.msk.f32.mxu0 %vm30_vm0, %v18_v14  ;;  %315 = vmatprep.mubr.msk.f32.mxu1 %vm30_vm0, %v26_v15  ;;  %p332_p3 = por %p331_p2, %p330_p1 }
  0x12   :  { %p333_p4 = pnand %p332_p3, %p326_p0 }
  0x13   :  { %304 = vmatmul.mubr.msk.f32.gmra.mxu0 %vm30_vm0, %v19_v16  ;;  %316 = vmatmul.mubr.msk.f32.gmra.mxu1 %vm30_vm0, %v27_v17 }
  0xc7   :  { %v296_v18 = vpop.f32.mrf.mxu0  ;;  %v308_v19 = vpop.f32.mrf.mxu1 }
  0xc8   :  { %225 = vst [vmem:[#allocation2 + $0x8] sm:$0xff] %v296_v18  ;;  %233 = vst [vmem:[#allocation2 + $0x48] sm:$0xff] %v308_v19 }
  0xc9   :  { %v145_v20 = vpop.f32.mrf.mxu0  ;;  %v185_v21 = vpop.f32.mrf.mxu1 }
  0xca   :  { %224 = vst [vmem:[#allocation2] sm:$0xff] %v145_v20  ;;  %232 = vst [vmem:[#allocation2 + $0x40] sm:$0xff] %v185_v21 }
  0xcb   :  { %v299_v22 = vpop.f32.mrf.mxu0  ;;  %v311_v23 = vpop.f32.mrf.mxu1 }
  0xcc   :  { %227 = vst [vmem:[#allocation2 + $0x18] sm:$0xff] %v299_v22  ;;  %235 = vst [vmem:[#allocation2 + $0x58] sm:$0xff] %v311_v23 }
  0xcd   :  { %v155_v24 = vpop.f32.mrf.mxu0  ;;  %v195_v25 = vpop.f32.mrf.mxu1 }
  0xce   :  { %226 = vst [vmem:[#allocation2 + $0x10] sm:$0xff] %v155_v24  ;;  %234 = vst [vmem:[#allocation2 + $0x50] sm:$0xff] %v195_v25 }
  0xcf   :  { %v302_v26 = vpop.f32.mrf.mxu0  ;;  %v314_v27 = vpop.f32.mrf.mxu1 }
  0xd0   :  { %229 = vst [vmem:[#allocation2 + $0x28] sm:$0xff] %v302_v26  ;;  %237 = vst [vmem:[#allocation2 + $0x68] sm:$0xff] %v314_v27 }
  0xd1   :  { %v165_v28 = vpop.f32.mrf.mxu0  ;;  %v205_v29 = vpop.f32.mrf.mxu1 }
  0xd2   :  { %228 = vst [vmem:[#allocation2 + $0x20] sm:$0xff] %v165_v28  ;;  %236 = vst [vmem:[#allocation2 + $0x60] sm:$0xff] %v205_v29 }
  0xd3   :  { %v305_v30 = vpop.f32.mrf.mxu0  ;;  %v317_v31 = vpop.f32.mrf.mxu1 }
  0xd4   :  { %231 = vst [vmem:[#allocation2 + $0x38] sm:$0xff] %v305_v30  ;;  %239 = vst [vmem:[#allocation2 + $0x78] sm:$0xff] %v317_v31 }
  0xd5   :  { %v175_v32 = vpop.f32.mrf.mxu0  ;;  %v215_v33 = vpop.f32.mrf.mxu1 }
  0xd6   :  { %230 = vst [vmem:[#allocation2 + $0x30] sm:$0xff] %v175_v32  ;;  %238 = vst [vmem:[#allocation2 + $0x70] sm:$0xff] %v215_v33 }
  0xd7   :  { %336 = shalt.err (!%p333_p4)
}
  0xd8   :  { %s348_s18 = smov 128   ;;  %s349_s1 = smov 8  }
  0xd9   :  { %251 = dma.vmem_to_hbm [thread:$0]  %s246_s16, 2048, %s440_s2, [#allocation3], %s348_s18, %s348_s18, %s349_s1  }
  0xda   :  { %345 = dma.done.wait [#allocation3], 2048  }
  0xdb   :  { %346 = vsyncadd [#allocation3], 4294965248 }
  0xdc   :  { %255 = vsyncpa [#allocation3], 1 }

</bundles_post_ra>
